<compile_context>
chip_gen: v5e
topology: v5e:2x2
jax: 0.10.0
libtpu: 0.0.40
codegen_flags: <defaults>
</compile_context>

<pallas_src>
import functools

import jax
import jax.numpy as jnp
from jax import lax
from jax.experimental import pallas as pl
from jax.experimental.pallas import tpu as pltpu

BN_EPS = 1e-5
_LANES = 128


def _round_up(x, m):
    return (x + m - 1) // m * m


def _conv_bn_relu_kernel(src_ref, w_ref, g_ref, b_ref, out_ref, *,
                         taps, n_w_per_co, l_valid, row_block, col_block):
    """One output channel per grid step: out = relu(BN_train(conv(src))).

    src_ref : (C_src, N, W_src) f32 VMEM   channel-major source slab (resident)
    w_ref   : (Cout * n_w_per_co,) f32 SMEM  flat conv weights
    g_ref   : (Cout,) f32 SMEM   BN gamma
    b_ref   : (Cout,) f32 SMEM   BN beta
    out_ref : (1, N, W_out) f32 VMEM   this channel's lane-dense output slab

    taps: static tuple of (src_channel, col_offset, w_sub_index):
      pre[n, t] = sum_taps w[co*n_w_per_co + w_sub] * src[src_channel, n, col_offset + t]
    BN statistics use only columns [0, l_valid) (the un-padded length); the
    variance is the numerically safe two-pass (centered) form.
    """
    co = pl.program_id(0)
    n = out_ref.shape[1]
    w_out = out_ref.shape[2]
    inv_cnt = 1.0 / float(n * l_valid)
    wbase = co * n_w_per_co

    # ---- pass 1: conv accumulation in small chunks, each chunk written once;
    #              the raw per-channel sum (for the mean) is fused in.
    total = jnp.float32(0.0)
    for r0 in range(0, n, row_block):
        rn = min(row_block, n - r0)
        for c0 in range(0, w_out, col_block):
            cn = min(col_block, w_out - c0)
            acc = None
            for (sc, coff, wsub) in taps:
                w = w_ref[wbase + wsub]                          # SMEM scalar
                part = w * src_ref[sc, pl.ds(r0, rn), pl.ds(coff + c0, cn)]
                acc = part if acc is None else acc + part
            out_ref[0, pl.ds(r0, rn), pl.ds(c0, cn)] = acc
            v = min(cn, l_valid - c0)                            # static
            if v > 0:
                total = total + jnp.sum(acc if v == cn else acc[:, :v])
    mean = total * inv_cnt

    # ---- pass 2: centered sum of squares (two-pass variance) ----------------
    ssq = jnp.float32(0.0)
    for r0 in range(0, n, row_block):
        rn = min(row_block, n - r0)
        for c0 in range(0, l_valid, col_block):
            cn = min(col_block, l_valid - c0)
            d = out_ref[0, pl.ds(r0, rn), pl.ds(c0, cn)] - mean
            ssq = ssq + jnp.sum(d * d)
    var = ssq * inv_cnt
    scale = g_ref[co] * lax.rsqrt(var + BN_EPS)
    shift = b_ref[co] - mean * scale

    # ---- pass 3: in-place normalize + ReLU over the full lane-dense width ---
    for r0 in range(0, n, row_block):
        rn = min(row_block, n - r0)
        for c0 in range(0, w_out, col_block):
            cn = min(col_block, w_out - c0)
            blk = out_ref[0, pl.ds(r0, rn), pl.ds(c0, cn)]
            out_ref[0, pl.ds(r0, rn), pl.ds(c0, cn)] = jnp.maximum(
                blk * scale + shift, 0.0)


def _vmem_limit_bytes(est_bytes):
    cap = 48 * 1024 * 1024  # conservative fallback (safe on v5e/v6e/v7x)
    get_info = getattr(pltpu, "get_tpu_info", None)
    if get_info is not None:
        try:
            cap = int(get_info().vmem_capacity_bytes) * 7 // 8
        except Exception:
            pass
    return int(min(cap, max(est_bytes, 8 * 1024 * 1024)))


def _conv_bn_relu(src, w_flat, gamma, beta, *, taps, n_w_per_co, cout, n,
                  w_out, l_valid):
    """pallas_call wrapper: grid over output channels, 'parallel' semantics."""
    row_block = min(n, 8)
    col_block = min(w_out, 1024)
    kern = functools.partial(
        _conv_bn_relu_kernel, taps=tuple(taps), n_w_per_co=n_w_per_co,
        l_valid=l_valid, row_block=row_block, col_block=col_block)

    # Whole src resident + (double-buffered) per-channel output slab + slack.
    est = 4 * src.size + 3 * 4 * n * w_out + (4 << 20)

    return pl.pallas_call(
        kern,
        out_shape=jax.ShapeDtypeStruct((cout, n, w_out), jnp.float32),
        grid=(cout,),
        in_specs=[
            pl.BlockSpec(memory_space=pltpu.MemorySpace.VMEM),   # src slab
            pl.BlockSpec(memory_space=pltpu.MemorySpace.SMEM),   # conv weights
            pl.BlockSpec(memory_space=pltpu.MemorySpace.SMEM),   # gamma
            pl.BlockSpec(memory_space=pltpu.MemorySpace.SMEM),   # beta
        ],
        out_specs=pl.BlockSpec((1, n, w_out), lambda co: (co, 0, 0)),
        compiler_params=pltpu.CompilerParams(
            dimension_semantics=("parallel",),
            vmem_limit_bytes=_vmem_limit_bytes(est)),
    )(src, w_flat, gamma, beta)


def first_unpooled_conv_then_pooled_conv(x, w1, b1, w2, b2, gamma, beta,
                                         *, kernel=2, pool=1):
    """x: (N, Cin, L) f32.  Returns (leftskip (N,Cout,L), out (N,Cout,Lout2)).

    b1/b2 are accepted for API parity only: a per-channel bias added right
    before a training-mode BatchNorm is cancelled by the mean subtraction.
    """
    del b1, b2
    N, Cin, L = x.shape
    Cout = w1.shape[0]
    K = kernel
    stride = pool
    Lout2 = (L - K) // stride + 1
    lp = (K - 1) // 2                  # PyTorch 'same': pad less on the left

    # lane-dense (multiple-of-128) working widths; for stride==1 the second
    # conv reads leftskip columns up to L2pad + K - 2, so size W1 accordingly.
    L2pad = _round_up(Lout2, _LANES)
    if stride == 1:
        W1 = _round_up(max(L, L2pad + K - 1), _LANES)
    else:
        W1 = _round_up(L, _LANES)
    Wx = W1 + (K - 1)

    # channel-major layout + 'same' zero padding, done once in the wrapper.
    x_cm = jnp.transpose(x.astype(jnp.float32), (1, 0, 2))        # (Cin, N, L)
    x_pad = jnp.pad(x_cm, ((0, 0), (0, 0), (lp, Wx - lp - L)))    # (Cin, N, Wx)

    w1_flat = w1.astype(jnp.float32).reshape(-1)                  # (Cout*Cin*K,)
    w2_flat = w2.astype(jnp.float32).reshape(-1)                  # (Cout*Cout*K,)
    g = gamma.astype(jnp.float32)
    b = beta.astype(jnp.float32)

    # ---- stage 1: conv1 ('same') -> BN(train) -> ReLU -----------------------
    taps1 = tuple((ci, j, ci * K + j) for ci in range(Cin) for j in range(K))
    left_pad = _conv_bn_relu(x_pad, w1_flat, g, b, taps=taps1,
                             n_w_per_co=Cin * K, cout=Cout, n=N,
                             w_out=W1, l_valid=L)                 # (Cout, N, W1)
    leftskip = jnp.transpose(left_pad[:, :, :L], (1, 0, 2))       # (N, Cout, L)

    # ---- stage 2: conv2 (valid, stride=pool) -> BN(train) -> ReLU -----------
    if stride == 1:
        src2 = left_pad                                           # (Cout, N, W1)
        taps2 = tuple((ci, j, ci * K + j)
                      for ci in range(Cout) for j in range(K))
    else:
        # stride-`pool` decimation as K cheap XLA strided slices (layout
        # plumbing): Mosaic has no lane-strided vector access, and this also
        # cuts the second conv's FMA work by a factor of `pool`.
        last = (Lout2 - 1) * stride
        dec = [lax.slice(left_pad, (0, 0, j), (Cout, N, j + last + 1),
                         (1, 1, stride)) for j in range(K)]
        src2 = jnp.pad(jnp.concatenate(dec, axis=0),
                       ((0, 0), (0, 0), (0, L2pad - Lout2)))      # (K*Cout,N,L2pad)
        taps2 = tuple((j * Cout + ci, 0, ci * K + j)
                      for ci in range(Cout) for j in range(K))

    out_pad = _conv_bn_relu(src2, w2_flat, g, b, taps=taps2,
                            n_w_per_co=Cout * K, cout=Cout, n=N,
                            w_out=L2pad, l_valid=Lout2)           # (Cout,N,L2pad)
    out = jnp.transpose(out_pad[:, :, :Lout2], (1, 0, 2))         # (N,Cout,Lout2)
    return leftskip, out


def _reference(x, w1, b1, w2, b2, gamma, beta, *, kernel=2, pool=1):
    """Pure-JAX reference (lax.conv is cross-correlation, same as torch).
    Keeps the biases to show they are cancelled by train-mode BN."""
    K = kernel
    lp = (K - 1) // 2
    rp = (K - 1) - lp
    g = gamma[None, :, None]
    bt = beta[None, :, None]

    def bn_relu(y):
        m = jnp.mean(y, axis=(0, 2), keepdims=True)
        v = jnp.mean((y - m) ** 2, axis=(0, 2), keepdims=True)
        return jnp.maximum((y - m) / jnp.sqrt(v + BN_EPS) * g + bt, 0.0)

    xp = jnp.pad(x, ((0, 0), (0, 0), (lp, rp)))
    y1 = lax.conv_general_dilated(xp, w1, (1,), 'VALID',
                                  dimension_numbers=('NCH', 'OIH', 'NCH'))
    left = bn_relu(y1 + b1[None, :, None])
    y2 = lax.conv_general_dilated(left, w2, (pool,), 'VALID',
                                  dimension_numbers=('NCH', 'OIH', 'NCH'))
    out = bn_relu(y2 + b2[None, :, None])
    return left, out


def _run_case(seed, N, in_filters, out_filters, kernel, pool, L):
    key = jax.random.PRNGKey(seed)
    kx, k1, kb1, k2, kb2, kg, kb = jax.random.split(key, 7)
    x = jax.random.normal(kx, (N, in_filters, L), jnp.float32)
    w1 = jax.random.normal(k1, (out_filters, in_filters, kernel), jnp.float32) * 0.5
    b1 = jax.random.normal(kb1, (out_filters,), jnp.float32) * 0.1
    w2 = jax.random.normal(k2, (out_filters, out_filters, kernel), jnp.float32) * 0.5
    b2 = jax.random.normal(kb2, (out_filters,), jnp.float32) * 0.1
    gamma = 1.0 + 0.1 * jax.random.normal(kg, (out_filters,), jnp.float32)
    beta = 0.1 * jax.random.normal(kb, (out_filters,), jnp.float32)

    leftskip, out = first_unpooled_conv_then_pooled_conv(
        x, w1, b1, w2, b2, gamma, beta, kernel=kernel, pool=pool)
    jax.block_until_ready((leftskip, out))

    ref_left, ref_out = _reference(x, w1, b1, w2, b2, gamma, beta,
                                   kernel=kernel, pool=pool)
    Lout2 = (L - kernel) // pool + 1
    assert leftskip.shape == (N, out_filters, L)
    assert out.shape == (N, out_filters, Lout2)
    assert jnp.allclose(leftskip, ref_left, atol=1e-4, rtol=1e-4)
    assert jnp.allclose(out, ref_out, atol=1e-4, rtol=1e-4)


if __name__ == "__main__":
    # Module defaults: in_filters=1, out_filters=2, kernel=2, pool=1
    _run_case(seed=0, N=2, in_filters=1, out_filters=2, kernel=2, pool=1, L=16)
    # Exercise pool > 1 (wrapper-side polyphase decimation) and multi-channel.
    _run_case(seed=0, N=2, in_filters=3, out_filters=4, kernel=2, pool=2, L=32)
    print("KERNEL_OK")
</pallas_src>

<mosaic_0001>
module attributes {stable_mosaic.version = 11 : i64} {
  func.func @_conv_bn_relu_kernel(%arg0: i32, %arg1: memref<1x2x257xf32, #tpu.memory_space<vmem>>, %arg2: memref<4xf32, #tpu.memory_space<smem>>, %arg3: memref<2xf32, #tpu.memory_space<smem>>, %arg4: memref<2xf32, #tpu.memory_space<smem>>, %arg5: memref<1x2x256xf32, #tpu.memory_space<vmem>>) attributes {dimension_semantics = [#tpu.dimension_semantics<parallel>], iteration_bounds = array<i64: 2>, scalar_prefetch = 0 : i64, scratch_operands = 0 : i64, tpu.core_type = #tpu.core_type<tc>, window_params = [{pipeline_mode = #tpu.pipeline_mode<synchronous>, transform_indices = @transform_0, window_bounds = array<i64: 1, 2, 257>}, {transform_indices = @transform_1, window_bounds = array<i64: 4>}, {transform_indices = @transform_2, window_bounds = array<i64: 2>}, {transform_indices = @transform_3, window_bounds = array<i64: 2>}, {transform_indices = @transform_4, window_bounds = array<i64: 1, 2, 256>}]} {
    %c2_i32 = arith.constant 2 : i32
    %0 = arith.muli %arg0, %c2_i32 : i32
    %c0_i32 = arith.constant 0 : i32
    %1 = arith.addi %0, %c0_i32 : i32
    %2 = arith.index_cast %1 : i32 to index
    %3 = memref.load %arg2[%2] : memref<4xf32, #tpu.memory_space<smem>>
    %c0 = arith.constant 0 : index
    %c0_0 = arith.constant 0 : index
    %c0_1 = arith.constant 0 : index
    %4 = vector.load %arg1[%c0, %c0_0, %c0_1] : memref<1x2x257xf32, #tpu.memory_space<vmem>>, vector<1x2x256xf32>
    %5 = vector.shape_cast %4 : vector<1x2x256xf32> to vector<2x256xf32>
    %6 = vector.broadcast %3 : f32 to vector<2x256xf32>
    %7 = arith.mulf %6, %5 : vector<2x256xf32>
    %c1_i32 = arith.constant 1 : i32
    %8 = arith.addi %0, %c1_i32 : i32
    %9 = arith.index_cast %8 : i32 to index
    %10 = memref.load %arg2[%9] : memref<4xf32, #tpu.memory_space<smem>>
    %c0_2 = arith.constant 0 : index
    %c0_3 = arith.constant 0 : index
    %c1 = arith.constant 1 : index
    %11 = vector.load %arg1[%c0_2, %c0_3, %c1] : memref<1x2x257xf32, #tpu.memory_space<vmem>>, vector<1x2x256xf32>
    %12 = vector.shape_cast %11 : vector<1x2x256xf32> to vector<2x256xf32>
    %13 = vector.broadcast %10 : f32 to vector<2x256xf32>
    %14 = arith.mulf %13, %12 : vector<2x256xf32>
    %15 = arith.addf %7, %14 : vector<2x256xf32>
    %c0_4 = arith.constant 0 : index
    %c0_5 = arith.constant 0 : index
    %c0_6 = arith.constant 0 : index
    %16 = vector.load %arg5[%c0_4, %c0_5, %c0_6] : memref<1x2x256xf32, #tpu.memory_space<vmem>>, vector<1x2x256xf32>
    %17 = vector.shape_cast %16 : vector<1x2x256xf32> to vector<2x256xf32>
    %18 = vector.shape_cast %15 : vector<2x256xf32> to vector<1x2x256xf32>
    tpu.vector_store %arg5[%c0_4, %c0_5, %c0_6], %18 {strides = array<i32>} : memref<1x2x256xf32, #tpu.memory_space<vmem>>, vector<1x2x256xf32>,
    %19 = vector.extract_strided_slice %15 {offsets = [0, 0], sizes = [2, 16], strides = [1, 1]} : vector<2x256xf32> to vector<2x16xf32>
    %20 = vector.shape_cast %19 : vector<2x16xf32> to vector<1x2x16xf32>
    %cst = arith.constant dense<0.000000e+00> : vector<1xf32>
    %21 = vector.multi_reduction <add>, %20, %cst [1, 2] : vector<1x2x16xf32> to vector<1xf32>
    %22 = vector.shape_cast %21 : vector<1xf32> to vector<1x1x1xf32>
    %23 = vector.extract %22[0, 0, 0] : f32 from vector<1x1x1xf32>
    %cst_7 = arith.constant 0.000000e+00 : f32
    %24 = arith.addf %cst_7, %23 : f32
    %cst_8 = arith.constant 3.125000e-02 : f32
    %25 = arith.mulf %24, %cst_8 : f32
    %c0_9 = arith.constant 0 : index
    %c0_10 = arith.constant 0 : index
    %c0_11 = arith.constant 0 : index
    %26 = vector.load %arg5[%c0_9, %c0_10, %c0_11] : memref<1x2x256xf32, #tpu.memory_space<vmem>>, vector<1x2x16xf32>
    %27 = vector.shape_cast %26 : vector<1x2x16xf32> to vector<2x16xf32>
    %28 = vector.broadcast %25 : f32 to vector<2x16xf32>
    %29 = arith.subf %27, %28 : vector<2x16xf32>
    %30 = arith.mulf %29, %29 : vector<2x16xf32>
    %31 = vector.shape_cast %30 : vector<2x16xf32> to vector<1x2x16xf32>
    %cst_12 = arith.constant dense<0.000000e+00> : vector<1xf32>
    %32 = vector.multi_reduction <add>, %31, %cst_12 [1, 2] : vector<1x2x16xf32> to vector<1xf32>
    %33 = vector.shape_cast %32 : vector<1xf32> to vector<1x1x1xf32>
    %34 = vector.extract %33[0, 0, 0] : f32 from vector<1x1x1xf32>
    %cst_13 = arith.constant 0.000000e+00 : f32
    %35 = arith.addf %cst_13, %34 : f32
    %cst_14 = arith.constant 3.125000e-02 : f32
    %36 = arith.mulf %35, %cst_14 : f32
    %37 = arith.index_cast %arg0 : i32 to index
    %38 = memref.load %arg3[%37] : memref<2xf32, #tpu.memory_space<smem>>
    %cst_15 = arith.constant 9.99999974E-6 : f32
    %39 = arith.addf %36, %cst_15 : f32
    %40 = math.rsqrt %39 : f32
    %41 = arith.mulf %38, %40 : f32
    %42 = arith.index_cast %arg0 : i32 to index
    %43 = memref.load %arg4[%42] : memref<2xf32, #tpu.memory_space<smem>>
    %44 = arith.mulf %25, %41 : f32
    %45 = arith.subf %43, %44 : f32
    %c0_16 = arith.constant 0 : index
    %c0_17 = arith.constant 0 : index
    %c0_18 = arith.constant 0 : index
    %46 = vector.load %arg5[%c0_16, %c0_17, %c0_18] : memref<1x2x256xf32, #tpu.memory_space<vmem>>, vector<1x2x256xf32>
    %47 = vector.shape_cast %46 : vector<1x2x256xf32> to vector<2x256xf32>
    %48 = vector.broadcast %41 : f32 to vector<2x256xf32>
    %49 = arith.mulf %47, %48 : vector<2x256xf32>
    %50 = vector.broadcast %45 : f32 to vector<2x256xf32>
    %51 = arith.addf %49, %50 : vector<2x256xf32>
    %cst_19 = arith.constant 0.000000e+00 : f32
    %52 = vector.broadcast %cst_19 : f32 to vector<2x256xf32>
    %53 = arith.maximumf %51, %52 : vector<2x256xf32>
    %c0_20 = arith.constant 0 : index
    %c0_21 = arith.constant 0 : index
    %c0_22 = arith.constant 0 : index
    %54 = vector.load %arg5[%c0_20, %c0_21, %c0_22] : memref<1x2x256xf32, #tpu.memory_space<vmem>>, vector<1x2x256xf32>
    %55 = vector.shape_cast %54 : vector<1x2x256xf32> to vector<2x256xf32>
    %56 = vector.shape_cast %53 : vector<2x256xf32> to vector<1x2x256xf32>
    tpu.vector_store %arg5[%c0_20, %c0_21, %c0_22], %56 {strides = array<i32>} : memref<1x2x256xf32, #tpu.memory_space<vmem>>, vector<1x2x256xf32>,
    return
  }
  func.func @transform_0(%arg0: i32) -> (i32, i32, i32) {
    %c0_i32 = arith.constant 0 : i32
    %c0_i32_0 = arith.constant 0 : i32
    %c0_i32_1 = arith.constant 0 : i32
    %c0_i32_2 = arith.constant 0 : i32
    return %c0_i32, %c0_i32_0, %c0_i32_1 : i32, i32, i32
  }
  func.func @transform_1(%arg0: i32) -> i32 {
    %c0_i32 = arith.constant 0 : i32
    %c0_i32_0 = arith.constant 0 : i32
    return %c0_i32 : i32
  }
  func.func @transform_2(%arg0: i32) -> i32 {
    %c0_i32 = arith.constant 0 : i32
    %c0_i32_0 = arith.constant 0 : i32
    return %c0_i32 : i32
  }
  func.func @transform_3(%arg0: i32) -> i32 {
    %c0_i32 = arith.constant 0 : i32
    %c0_i32_0 = arith.constant 0 : i32
    return %c0_i32 : i32
  }
  func.func @transform_4(%arg0: i32) -> (i32, i32, i32) {
    %c0_i32 = arith.constant 0 : i32
    %c0_i32_0 = arith.constant 0 : i32
    %c0_i32_1 = arith.constant 0 : i32
    return %arg0, %c0_i32, %c0_i32_0 : i32, i32, i32
  }
}

</mosaic_0001>

<bundles_post_ra>
// kernel: tpu_custom_call.1
= control target key start
LH: loop header
LB: loop body
LE: loop exit
PB: predicated region body
PF: predicated region fallthrough
CT: control target
= control target key end

     0   :  { %9 = vsyncpa [#allocation3], 0  ;;  %s849_s0 = inlined_call_operand.hbm [shape: f32[1,2,257], index: 0, kind: input, shape index: {}]   ;;  %s850_s1 = inlined_call_operand.hbm [shape: f32[4], index: 1, kind: input, shape index: {}]   ;;  %s851_s2 = inlined_call_operand.vmem [shape: f32[2], index: 2, kind: input, shape index: {}]   ;;  %s852_s3 = inlined_call_operand.vmem [shape: f32[2], index: 3, kind: input, shape index: {}]   ;;  %s853_s4 = inlined_call_operand.hbm [shape: f32[2,2,256], index: 4, kind: output, shape index: {}]  }
   0x1   :  { %10 = vsyncpa [#allocation5], 0 }
   0x2   :  { %11 = vsyncpa [#allocation6], 0 }
   0x3   :  { %12 = vsyncpa [#allocation10], 0 }
   0x4   :  { %13 = vsyncpa [#allocation4], 0 }
   0x5   :  { %15 = vsyncpa [#allocation4 + $0x1], 0  ;;  %s707_s15 = smov 0   ;;  %s709_s16 = smov 0  }
   0x6   :  { %s711_s17 = smov 0   ;;  %s713_s18 = smov 0  }
   0x7 LB: > { %s728_s19 = sadd.s32 4294967295, %s675_s18   ;;  %s414_s20 = sadd.s32 4294967294, %s675_s18   ;;  %s675_s18 = sphi %s713_s18, %s860_s18   ;;  %s671_s17 = sphi %s711_s17, %s859_s17   ;;  %s667_s16 = sphi %s709_s16, %s858_s16   ;;  %s663_s15 = sphi %s707_s15, %s857_s15  }
   0x8   : > { %s732_s21 = sadd.s32 1, %s675_s18   ;;  %s112_s22 = sadd.s32 1, %s671_s17 }
   0x9   : > { %s109_s23 = ssub.s32 %s675_s18, %s732_s21  ;;  %p122_p0 = scmp.ne.s32.totalorder %s671_s17, %s667_s16 }
   0xa   : > { %p110_p1 = scmp.eq.s32.totalorder %s109_s23, 0  ;;  %p123_p2 = scmp.eq.s32.totalorder %s728_s19, 1 }
   0xb   : > { %p128_p3 = scmp.ne.s32.totalorder %s667_s16, %s663_s15  ;;  %p129_p4 = scmp.eq.s32.totalorder %s414_s20, 1 }
   0xc   : > { %s743_s24 = scalar_select %p110_p1, %s671_s17, %s112_s22  }
   0xd   : > { %p745_p5 = por %p123_p2, %p122_p0  ;;  %p749_p6 = por %p129_p4, %p128_p3 }
   0xe   : > { %p415_p7 = scmp.ge.s32.totalorder %s675_s18, 1  ;;  %p136_p8 = scmp.lt.s32.totalorder %s675_s18, 3 }
   0xf   : > { %p474_p9 = scmp.eq.s32.totalorder %s728_s19, 0  ;;  %s148_s30 = sshll.u32 %s849_s0, 4  ;;  %s149_s30 = int_to_ptr.hbm [resolvable:$true] %s148_s30 }
  0x10   : > { %p756_p10 = pnand %p415_p7, %p136_p8  ;;  %s677_s5 = smov [#allocation2]  }
  0x11   : > { %s150_s6 = sshll.u32 %s677_s5, 4  ;;  %s160_s9 = sshll.u32 %s850_s1, 4  ;;  %s151_s6 = int_to_ptr.vmem [resolvable:$true] %s150_s6  ;;  %s161_s9 = int_to_ptr.hbm [resolvable:$true] %s160_s9 }
  0x12   : > { %p457_p11 = pneg %p756_p10  ;;  %s170_s12 = sshll.u32 %s851_s2, 4  ;;  %s171_s12 = int_to_ptr.vmem [resolvable:$true] %s170_s12 }
  0x13   : > { %s678_s13 = smov [#allocation7]   ;;  %s180_s22 = sshll.u32 %s852_s3, 4  ;;  %s181_s22 = int_to_ptr.vmem [resolvable:$true] %s180_s22 }
  0x14   : > { %p458_p12 = pnand %p474_p9, %p457_p11  ;;  %s679_s23 = smov [#allocation8]  }
  0x15   : > { %s680_s28 = smov [#allocation9]   ;;  %193 = sbr.rel (%p756_p10) target bundleno = 618 (0x26a), region = 36 }
  0x16   : > { %460 = dma.hbm_to_vmem [thread:$0]  (!%p458_p12), %s149_s30, 96, %s151_s6, [#allocation3]  }
  0x17   : > { %463 = dma.hbm_to_smem (!%p458_p12), %s161_s9, 16, %s678_s13, [#allocation5]  }
  0x18   : > { %466 = dma.vmem_to_smem (!%p458_p12), %s171_s12, 16, %s679_s23, [#allocation6]  }
  0x19   : > { %469 = dma.vmem_to_smem (!%p458_p12), %s181_s22, 16, %s680_s28, [#allocation10]  }
  0x1a   : > { %642 = dma.done.wait (%p474_p9), [#allocation3], 96  }
  0x1b   : > { %644 = vsyncadd (%p474_p9), [#allocation3], 4294967200 }
  0x1c   : > { %646 = dma.done.wait (%p474_p9), [#allocation5], 16  }
  0x1d   : > { %648 = vsyncadd (%p474_p9), [#allocation5], 4294967280 }
  0x1e   : > { %650 = dma.done.wait (%p474_p9), [#allocation6], 16  }
  0x1f   : > { %652 = vsyncadd (%p474_p9), [#allocation6], 4294967280 }
  0x20   : > { %654 = dma.done.wait (%p474_p9), [#allocation10], 16  }
  0x21   : > { %656 = vsyncadd (%p474_p9), [#allocation10], 4294967280 }
  0x22   : > { %215 = sfence }
  0x23   : > { %s426_s27 = sshll.u32 %s728_s19, 1  ;;  %v238_v0 = vld [vmem:[#allocation2] sm:$0x3f]  ;;  %s681_s5 = smov 127   ;;  %vm245_vm0 = vcmask 1039360   ;;  %vm250_vm1 = vcmask 123904  }
  0x24   : > { %s236_s29 = sadd.s32 1, %s426_s27  ;;  %s232_s6 = sld [smem:[#allocation7 + %s426_s27]]  ;;  %v233_v3 = vld [vmem:[#allocation2] sm:$0xf] }
  0x25   : > { %s237_s30 = sld [smem:[#allocation7 + %s236_s29]]  ;;  %s228_s7 = sand.u32 1, %s667_s16  }
  0x26   : > { %s425_s8 = sshll.u32 %s228_s7, 2  ;;  %s279_s20 = sld [smem:[#allocation8 + %s728_s19]] }
  0x27   : > { %s799_s9 = scalar_lea.vmem [#allocation11], %s425_s8  ;;  %s294_s22 = sld [smem:[#allocation9 + %s728_s19]] }
  0x28   : > { %s432_s27 = sshll.u32 %s728_s19, 2  ;;  %s305_s19 = scalar_lea.sflag [#allocation4], %s228_s7 }
  0x2a   : > { %v234_v4 = vstv %s232_s6  ;;  %s316_s6 = scalar_lea.hbm %s853_s4, %s432_s27 }
  0x2b   : > { %v239_v1 = vstv %s237_s30  ;;  %v235_v6 = vmul.f32 %v234_v4, %v233_v3 }
  0x2c   : > { %v240_v2 = vmul.f32 %v239_v1, %v238_v0 }
  0x2e   : > { %242 = vrot.lane.b32.xlu0 %v240_v2, %s681_s5 }
  0xa0   : > { %v243_v5 = vpop.permute.xlu0 %242 }
  0xa1   : > { %v244_v7 = vrot.slane %v243_v5, 2 }
  0xa3   : > { %v246_v8 = vsel %vm245_vm0, %v243_v5, %v244_v7 }
  0xa4   : > { %v248_v9 = vadd.f32 %v246_v8, %v235_v6 }
  0xa6   : > { %v251_v10 = vsel %vm250_vm1, %v248_v9, 0.0  ;;  %249 = vst [vmem:[%s799_s9] sm:$0xf] %v248_v9 }
  0xa7   : > { %252 = vadd.xlane.f32.xlu0 %v251_v10 }
  0xad   : > { %v263_v19 = vld [vmem:[%s799_s9] sm:$0x3] }
  0xae   : > { %v297_v39 = vld [vmem:[%s799_s9] sm:$0xf] }
 0x11a   : > { %v253_v11 = vpop.xlane.xlu0 %252 }
 0x11b   : > { %v254_v12 = vrot.slane %v253_v11, 4 }
 0x11d   : > { %v255_v13 = vadd.f32 %v254_v12, %v253_v11 }
 0x11f   : > { %v256_v14 = vrot.slane %v255_v13, 2 }
 0x121   : > { %v257_v15 = vadd.f32 %v256_v14, %v255_v13 }
 0x123   : > { %v258_v16 = vrot.slane %v257_v15, 1 }
 0x125   : > { %v259_v17 = vadd.f32 %v258_v16, %v257_v15 }
 0x127   : > { %433 = vpush %v259_v17 }
 0x158   : > { %s802_s10 = spop %433 }
 0x159   : > { %s262_s11 = smul.f32 0.03125, %s802_s10 }
 0x15b   : > { %v264_v18 = vstv %s262_s11 }
 0x15c   : > { %v265_v20 = vsub.f32 %v263_v19, %v264_v18 }
 0x15e   : > { %v266_v21 = vmul.f32 %v265_v20, %v265_v20 }
 0x160   : > { %v267_v22 = vsel %vm250_vm1, %v266_v21, 0.0 }
 0x161   : > { %268 = vadd.xlane.f32.xlu1 %v267_v22 }
 0x1d4   : > { %v269_v23 = vpop.xlane.xlu1 %268 }
 0x1d5   : > { %v270_v24 = vrot.slane %v269_v23, 4 }
 0x1d7   : > { %v271_v25 = vadd.f32 %v270_v24, %v269_v23 }
 0x1d9   : > { %v272_v26 = vrot.slane %v271_v25, 2 }
 0x1db   : > { %v273_v27 = vadd.f32 %v272_v26, %v271_v25 }
 0x1dd   : > { %v274_v28 = vrot.slane %v273_v27, 1 }
 0x1df   : > { %v275_v29 = vadd.f32 %v274_v28, %v273_v27 }
 0x1e1   : > { %435 = vpush %v275_v29 }
 0x212   : > { %s436_s12 = spop %435 }
 0x213   : > { %s278_s13 = smul.f32 0.03125, %s436_s12  ;;  %s318_s12 = sshll.u32 %s799_s9, 4  ;;  %s319_s12 = int_to_ptr.vmem [resolvable:$true] %s318_s12 }
 0x215   : > { %s280_s14 = sadd.f32 1e-05, %s278_s13  ;;  %s320_s13 = sshll.u32 %s316_s6, 4  ;;  %s321_s13 = int_to_ptr.hbm [resolvable:$true] %s320_s13 }
 0x216   : > { %s611_s10 = sshra.s32 %s321_s13, 4  ;;  %s612_s10 = int_to_ptr.hbm [resolvable:$true] %s611_s10 }
 0x217   : > { %v281_v30 = vstv %s280_s14  ;;  %p618_p2 = scmp.lt.s32.totalorder %s612_s10, %s853_s4 }
 0x218   : > { %520 = vrsqrt.f32 %v281_v30  ;;  %vm288_vm3 = vweird.f32 %v281_v30 }
 0x21e   : > { %v521_v31 = vpop.eup %520 }
 0x21f   : > { %v283_v32 = vmul.f32 %v521_v31, %v281_v30  ;;  %vm289_vm2 = vweird.f32 %v521_v31 }
 0x220   : > { %vm290_vm4 = vmor %vm288_vm3, %vm289_vm2 }
 0x221   : > { %v284_v33 = vmul.f32 %v521_v31, %v283_v32 }
 0x223   : > { %v285_v34 = vmul.f32 0.5, %v284_v33 }
 0x225   : > { %v286_v35 = vsub.f32 1.5, %v285_v34 }
 0x227   : > { %v287_v36 = vmul.f32 %v521_v31, %v286_v35 }
 0x229   : > { %v291_v37 = vsel %vm290_vm4, %v521_v31, %v287_v36 }
 0x22a   : > { %437 = vpush %v291_v37 }
 0x25b   : > { %s438_s23 = spop %437 }
 0x25c   : > { %s293_s28 = smul.f32 %s438_s23, %s279_s20 }
 0x25e   : > { %s295_s29 = smul.f32 %s293_s28, %s262_s11  ;;  %v298_v38 = vstv %s293_s28  ;;  %s613_s11 = scalar_lea.hbm %s612_s10, 4 }
 0x25f   : > { %v299_v40 = vmul.f32 %v298_v38, %v297_v39  ;;  %p614_p13 = scmp.ne.s32.totalorder %s612_s10, %s613_s11 }
 0x260   : > { %s296_s8 = ssub.f32 %s294_s22, %s295_s29  ;;  %s617_s22 = scalar_lea.hbm %s853_s4, 8 }
 0x261   : > { %p615_p0 = pnand %p614_p13, %p745_p5  ;;  %p619_p3 = scmp.lt.s32.totalorder %s617_s22, %s613_s11 }
 0x262   : > { %v300_v41 = vstv %s296_s8 }
 0x263   : > { %v301_v42 = vadd.f32 %v300_v41, %v299_v40  ;;  %p616_p1 = pneg %p615_p0  ;;  %p620_p4 = por %p619_p3, %p618_p2 }
 0x265   : > { %v302_v43 = vmax.f32 %v301_v42, 0.0  ;;  %p621_p7 = pnand %p620_p4, %p616_p1 }
 0x267   : > { %303 = vst [vmem:[%s799_s9] sm:$0xf] %v302_v43 }
 0x268   : > { %624 = shalt.err (!%p621_p7)
}
 0x269   : > { %455 = dma.vmem_to_hbm [thread:$0]  (%p745_p5), %s319_s12, 64, %s321_s13, %s305_s19  }
 0x26a PF: > { %p482_p8 = scmp.ge.s32.totalorder %s675_s18, 2  ;;  %s332_s7 = sand.u32 1, %s663_s15  }
 0x26b   : > { %s333_s9 = scalar_lea.sflag [#allocation4], %s332_s7 }
 0x26c   : > { %p471_p9 = pnand %p482_p8, %p749_p6 }
 0x26e   : > { %p472_p10 = pneg %p471_p9 }
 0x270   : > { %658 = dma.done.wait (%p472_p10), %s333_s9, 64  }
 0x271   : > { %660 = vsyncadd (%p472_p10), %s333_s9, 4294967232  ;;  %p18_p11 = scmp.ge.s32.totalorder %s732_s21, 4   ;;  %s857_s15 = smov %s667_s16 }
 0x272   : > { %s858_s16 = smov %s671_s17  ;;  %s859_s17 = smov %s743_s24 }
 0x273   : > { %s860_s18 = smov %s732_s21  ;;  %20 = sbr.rel (!%p18_p11) target bundleno = 7 (0x7), region = 87 }
 0x278   :  { %339 = vsyncpa [#allocation3], 1 }
 0x279   :  { %341 = vsyncpa [#allocation3 + $0x1], 1 }
 0x27a   :  { %342 = vsyncpa [#allocation4], 1 }
 0x27b   :  { %344 = vsyncpa [#allocation4 + $0x1], 1 }
 0x27c   :  { %345 = vsyncpa [#allocation5], 1 }
 0x27d   :  { %347 = vsyncpa [#allocation5 + $0x1], 1 }
 0x27e   :  { %348 = vsyncpa [#allocation6], 1 }
 0x27f   :  { %350 = vsyncpa [#allocation6 + $0x1], 1 }
 0x280   :  { %351 = vsyncpa [#allocation10], 1 }

</bundles_post_ra>
